<compile_context>
chip_gen: v7x
topology: tpu7x:2x2x1
jax: 0.10.0
libtpu: 0.0.40
codegen_flags: <defaults>
</compile_context>

<pallas_src>
import functools
import math

import jax
import jax.numpy as jnp
from jax.experimental import pallas as pl
from jax.experimental.pallas import tpu as pltpu


def _round_up(x, m):
    return (x + m - 1) // m * m


def _conv_tap_kernel(x_ref, w_ref, b_ref, o_ref, *, taps, tile_h, w_out_p,
                     wf, cm, c_out, apply_relu):
    """One (batch, row-tile) grid step.

    x_ref: (Hf, s*Wf, s*C_in)  stride-folded reflect-padded image (resident
                               across the row-tile grid axis).
    w_ref: (T, C_out, s*C_in)  per-tap weight slabs (resident).
    b_ref: (C_out, 1)          bias (resident).
    o_ref: (C_out, tile_h*w_out_p)  lane-dense, channels-major output tile.
    """
    i = pl.program_id(1)
    r0 = pl.multiple_of(i * tile_h, tile_h)

    m = tile_h * w_out_p
    acc = jnp.zeros((c_out, m), jnp.float32)
    for t, (qh, ph, qw) in enumerate(taps):
        # Contiguous shifted window for this kernel tap: (tile_h, w_out_p, cm).
        xs = x_ref[pl.ds(r0 + qh, tile_h), pl.ds(ph * wf + qw, w_out_p), :]
        xm = xs.reshape(m, cm)          # free: w_out_p is a multiple of 8
        # (C_out, cm) . (m, cm)^T -> (C_out, m) on the MXU with f32 accumulate.
        acc = acc + jax.lax.dot_general(
            w_ref[t], xm,
            dimension_numbers=(((1,), (1,)), ((), ())),
            preferred_element_type=jnp.float32)
    acc = acc + b_ref[...]              # (C_out, 1) broadcast along lanes
    if apply_relu:
        acc = jnp.maximum(acc, 0.0)
    o_ref[...] = acc.astype(o_ref.dtype)


def _choose_tile_h(h_out, w_out_p, c_out, cm, target_bytes=4 << 20):
    """Output rows per grid step: big enough to amortize per-step overhead and
    feed >=128-wide MXU/store rows, small enough that the double-buffered
    output tile + live matmul operands stay a few MiB, and aligned so the
    flattened output block (tile_h*w_out_p) is a multiple of 128 lanes."""
    bytes_per_row = 4 * w_out_p * (3 * c_out + cm)   # 2x out dbuf + acc + xm
    cap = max(1, target_bytes // max(1, bytes_per_row))
    if cap >= h_out:
        return h_out                                  # whole image per step
    align = 128 // math.gcd(w_out_p, 128)
    tile = (cap // align) * align
    if tile <= 0:
        return h_out       # cannot tile legally under the budget; take full
    return min(tile, h_out)


@functools.partial(jax.jit, static_argnames=("stride", "is_last"))
def conv_layer(x, weight, bias, *, stride=1, is_last=False):
    """ConvLayer forward.

    x:      (B, C_in, H, W)       NCHW (PyTorch layout)
    weight: (C_out, C_in, K, K)   OIHW
    bias:   (C_out,)
    """
    B, C_in, H, W = x.shape
    C_out, _, KH, KW = weight.shape
    assert KH == KW, "ConvLayer uses square kernels"
    K = KH
    s = int(stride)
    p = K // 2

    Hp, Wp = H + 2 * p, W + 2 * p
    h_out = (Hp - K) // s + 1
    w_out = (Wp - K) // s + 1
    w_out_p = _round_up(w_out, 8)       # keeps the in-kernel reshape free
    q_cnt = -(-K // s)                  # folded-W taps per kernel row
    cm = s * C_in                       # folded channel dim
    T = K * q_cnt

    tile_h = _choose_tile_h(h_out, w_out_p, C_out, cm)
    n_h = pl.cdiv(h_out, tile_h)

    # Folded extents: every tap becomes a contiguous static slice.
    Hf = max(-(-Hp // s), n_h * tile_h + (K - 1) // s)
    Wf = max(-(-Wp // s), w_out_p + (K - 1) // s)

    # Reflect pad (the conv's own padding), go NHWC so channels ride the lane
    # axis, zero-extend to the folded extents, then fold the stride phases
    # into the row / channel axes.  The final reshape is free (row-major).
    x_pad = jnp.pad(x, ((0, 0), (0, 0), (p, p), (p, p)), mode="reflect")
    x_n = jnp.transpose(x_pad, (0, 2, 3, 1))                   # (B, Hp, Wp, C)
    x_n = jnp.pad(x_n, ((0, 0), (0, Hf * s - Hp), (0, Wf * s - Wp), (0, 0)))
    x_fold = x_n.reshape(B, Hf, s * Wf, cm)
    # TODO(synk): for a chain of ConvLayers, keep activations in this folded
    # NHWC form end-to-end instead of converting from/to NCHW per layer.

    # Per-tap weight slabs: slab[t][co, pw*C_in + c] = W[co, c, kh, qw*s + pw]
    # (zero-filled where qw*s+pw >= K).  Tap t uses folded row offset kh//s,
    # H-phase kh%s and folded column offset qw.
    taps, slabs = [], []
    for kh in range(K):
        for qw in range(q_cnt):
            cols = []
            for pw in range(s):
                kw = qw * s + pw
                if kw < K:
                    cols.append(weight[:, :, kh, kw])
                else:
                    cols.append(jnp.zeros((C_out, C_in), weight.dtype))
            slabs.append(jnp.concatenate(cols, axis=1))
            taps.append((kh // s, kh % s, qw))
    w_fold = jnp.stack(slabs, axis=0).astype(jnp.float32)      # (T, C_out, cm)
    b2d = bias.reshape(C_out, 1).astype(jnp.float32)

    kernel = functools.partial(
        _conv_tap_kernel, taps=tuple(taps), tile_h=tile_h, w_out_p=w_out_p,
        wf=Wf, cm=cm, c_out=C_out, apply_relu=not is_last)

    # VMEM budget: double-buffered pipeline buffers + live values (+ slack).
    def _tiled(r, c):
        return _round_up(r, 8) * _round_up(c, 128) * 4
    m = tile_h * w_out_p
    vmem_bytes = (2 * Hf * _tiled(s * Wf, cm)          # input image buffers
                  + 2 * T * _tiled(C_out, cm)          # weights
                  + 2 * _tiled(C_out, 128)             # bias
                  + 2 * _tiled(C_out, m)               # output tile buffers
                  + _tiled(m, cm) + 2 * _tiled(C_out, m)   # live xm / acc
                  + (2 << 20))                         # slack
    vmem_limit = int(min(max(vmem_bytes, 32 << 20), 48 << 20))

    flops = 2 * B * h_out * w_out * C_out * C_in * K * K \
        + 2 * B * h_out * w_out * C_out
    bytes_accessed = 4 * (B * Hf * s * Wf * cm + T * C_out * cm + C_out
                          + B * C_out * h_out * w_out_p)

    out = pl.pallas_call(
        kernel,
        out_shape=jax.ShapeDtypeStruct((B, C_out, h_out * w_out_p), x.dtype),
        grid=(B, n_h),
        in_specs=[
            # Whole folded image per batch element, resident across row tiles.
            pl.BlockSpec((None, Hf, s * Wf, cm), lambda b, i: (b, 0, 0, 0)),
            pl.BlockSpec((T, C_out, cm), lambda b, i: (0, 0, 0)),   # resident
            pl.BlockSpec((C_out, 1), lambda b, i: (0, 0)),          # resident
        ],
        out_specs=pl.BlockSpec((None, C_out, tile_h * w_out_p),
                               lambda b, i: (b, 0, i)),
        compiler_params=pltpu.CompilerParams(
            dimension_semantics=("parallel", "parallel"),
            vmem_limit_bytes=vmem_limit),
        cost_estimate=pl.CostEstimate(
            flops=flops, transcendentals=0, bytes_accessed=bytes_accessed),
    )(x_fold, w_fold, b2d)

    # Channels-major output reshapes straight to NCHW -- no transpose.
    y = out.reshape(B, C_out, h_out, w_out_p)
    if w_out_p != w_out:
        y = y[:, :, :, :w_out]
    return y


def _reference_conv_layer(x, weight, bias, *, stride=1, is_last=False):
    K = weight.shape[2]
    p = K // 2
    x_pad = jnp.pad(x, ((0, 0), (0, 0), (p, p), (p, p)), mode="reflect")
    y = jax.lax.conv_general_dilated(
        x_pad, weight, window_strides=(stride, stride), padding="VALID",
        dimension_numbers=("NCHW", "OIHW", "NCHW"))
    y = y + bias[None, :, None, None]
    if not is_last:
        y = jnp.maximum(y, 0.0)
    return y


if __name__ == "__main__":
    key = jax.random.PRNGKey(0)
    kx, kw, kb = jax.random.split(key, 3)

    B, C_in, H, W = 2, 4, 16, 16
    C_out, K = 8, 3

    x = jax.random.normal(kx, (B, C_in, H, W), jnp.float32)
    weight = 0.1 * jax.random.normal(kw, (C_out, C_in, K, K), jnp.float32)
    bias = 0.05 * jax.random.normal(kb, (C_out,), jnp.float32)

    # ConvLayer(in=4, out=8, kernel=3, stride=1)        -> conv + ReLU
    y1 = conv_layer(x, weight, bias, stride=1, is_last=False)
    # ConvLayer(in=4, out=8, kernel=3, stride=2, last)  -> conv only
    y2 = conv_layer(x, weight, bias, stride=2, is_last=True)
    jax.block_until_ready(y1)
    jax.block_until_ready(y2)

    ref1 = _reference_conv_layer(x, weight, bias, stride=1, is_last=False)
    ref2 = _reference_conv_layer(x, weight, bias, stride=2, is_last=True)

    assert y1.shape == ref1.shape and y2.shape == ref2.shape
    assert jnp.allclose(y1, ref1, atol=2e-3, rtol=2e-3)
    assert jnp.allclose(y2, ref2, atol=2e-3, rtol=2e-3)

    print("KERNEL_OK")
</pallas_src>

<mosaic_0001>
module attributes {stable_mosaic.version = 11 : i64} {
  func.func @_conv_tap_kernel(%arg0: i32, %arg1: i32, %arg2: memref<1x18x18x4xf32, #tpu.memory_space<vmem>>, %arg3: memref<9x8x4xf32, #tpu.memory_space<vmem>>, %arg4: memref<8x1xf32, #tpu.memory_space<vmem>>, %arg5: memref<1x8x256xf32, #tpu.memory_space<vmem>>) attributes {dimension_semantics = [#tpu.dimension_semantics<parallel>, #tpu.dimension_semantics<parallel>], iteration_bounds = array<i64: 2, 1>, scalar_prefetch = 0 : i64, scratch_operands = 0 : i64, tpu.core_type = #tpu.core_type<tc>, window_params = [{transform_indices = @transform_0, window_bounds = array<i64: 1, 18, 18, 4>}, {pipeline_mode = #tpu.pipeline_mode<synchronous>, transform_indices = @transform_1, window_bounds = array<i64: 9, 8, 4>}, {pipeline_mode = #tpu.pipeline_mode<synchronous>, transform_indices = @transform_2, window_bounds = array<i64: 8, 1>}, {transform_indices = @transform_3, window_bounds = array<i64: 1, 8, 256>}]} {
    %c16_i32 = arith.constant 16 : i32
    %0 = arith.muli %arg1, %c16_i32 : i32
    %1 = tpu.assume_multiple %0, 16 : i32
    %cst = arith.constant 0.000000e+00 : f32
    %2 = vector.broadcast %cst : f32 to vector<8x256xf32>
    %c0_i32 = arith.constant 0 : i32
    %3 = arith.addi %1, %c0_i32 : i32
    %c0 = arith.constant 0 : index
    %4 = arith.index_cast %3 : i32 to index
    %c0_0 = arith.constant 0 : index
    %c0_1 = arith.constant 0 : index
    %5 = vector.load %arg2[%c0, %4, %c0_0, %c0_1] : memref<1x18x18x4xf32, #tpu.memory_space<vmem>>, vector<1x16x16x4xf32>
    %6 = vector.shape_cast %5 : vector<1x16x16x4xf32> to vector<16x16x4xf32>
    %7 = vector.shape_cast %6 : vector<16x16x4xf32> to vector<256x4xf32>
    %c0_2 = arith.constant 0 : index
    %c0_3 = arith.constant 0 : index
    %c0_4 = arith.constant 0 : index
    %8 = vector.load %arg3[%c0_2, %c0_3, %c0_4] : memref<9x8x4xf32, #tpu.memory_space<vmem>>, vector<1x8x4xf32>
    %9 = vector.shape_cast %8 : vector<1x8x4xf32> to vector<8x4xf32>
    %cst_5 = arith.constant dense<0.000000e+00> : vector<8x256xf32>
    %10 = tpu.matmul %9, %7, %cst_5 {dimension_numbers = #tpu.dot_dimension_numbers<[1], [1], [0], [0], [0, 0, 1, 0], [], []>} : vector<8x4xf32>, vector<256x4xf32>, vector<8x256xf32> -> vector<8x256xf32>
    %11 = arith.addf %2, %10 : vector<8x256xf32>
    %c0_i32_6 = arith.constant 0 : i32
    %12 = arith.addi %1, %c0_i32_6 : i32
    %c0_7 = arith.constant 0 : index
    %13 = arith.index_cast %12 : i32 to index
    %c1 = arith.constant 1 : index
    %c0_8 = arith.constant 0 : index
    %14 = vector.load %arg2[%c0_7, %13, %c1, %c0_8] : memref<1x18x18x4xf32, #tpu.memory_space<vmem>>, vector<1x16x16x4xf32>
    %15 = vector.shape_cast %14 : vector<1x16x16x4xf32> to vector<16x16x4xf32>
    %16 = vector.shape_cast %15 : vector<16x16x4xf32> to vector<256x4xf32>
    %c1_9 = arith.constant 1 : index
    %c0_10 = arith.constant 0 : index
    %c0_11 = arith.constant 0 : index
    %17 = vector.load %arg3[%c1_9, %c0_10, %c0_11] : memref<9x8x4xf32, #tpu.memory_space<vmem>>, vector<1x8x4xf32>
    %18 = vector.shape_cast %17 : vector<1x8x4xf32> to vector<8x4xf32>
    %cst_12 = arith.constant dense<0.000000e+00> : vector<8x256xf32>
    %19 = tpu.matmul %18, %16, %cst_12 {dimension_numbers = #tpu.dot_dimension_numbers<[1], [1], [0], [0], [0, 0, 1, 0], [], []>} : vector<8x4xf32>, vector<256x4xf32>, vector<8x256xf32> -> vector<8x256xf32>
    %20 = arith.addf %11, %19 : vector<8x256xf32>
    %c0_i32_13 = arith.constant 0 : i32
    %21 = arith.addi %1, %c0_i32_13 : i32
    %c0_14 = arith.constant 0 : index
    %22 = arith.index_cast %21 : i32 to index
    %c2 = arith.constant 2 : index
    %c0_15 = arith.constant 0 : index
    %23 = vector.load %arg2[%c0_14, %22, %c2, %c0_15] : memref<1x18x18x4xf32, #tpu.memory_space<vmem>>, vector<1x16x16x4xf32>
    %24 = vector.shape_cast %23 : vector<1x16x16x4xf32> to vector<16x16x4xf32>
    %25 = vector.shape_cast %24 : vector<16x16x4xf32> to vector<256x4xf32>
    %c2_16 = arith.constant 2 : index
    %c0_17 = arith.constant 0 : index
    %c0_18 = arith.constant 0 : index
    %26 = vector.load %arg3[%c2_16, %c0_17, %c0_18] : memref<9x8x4xf32, #tpu.memory_space<vmem>>, vector<1x8x4xf32>
    %27 = vector.shape_cast %26 : vector<1x8x4xf32> to vector<8x4xf32>
    %cst_19 = arith.constant dense<0.000000e+00> : vector<8x256xf32>
    %28 = tpu.matmul %27, %25, %cst_19 {dimension_numbers = #tpu.dot_dimension_numbers<[1], [1], [0], [0], [0, 0, 1, 0], [], []>} : vector<8x4xf32>, vector<256x4xf32>, vector<8x256xf32> -> vector<8x256xf32>
    %29 = arith.addf %20, %28 : vector<8x256xf32>
    %c1_i32 = arith.constant 1 : i32
    %30 = arith.addi %1, %c1_i32 : i32
    %c0_20 = arith.constant 0 : index
    %31 = arith.index_cast %30 : i32 to index
    %c0_21 = arith.constant 0 : index
    %c0_22 = arith.constant 0 : index
    %32 = vector.load %arg2[%c0_20, %31, %c0_21, %c0_22] : memref<1x18x18x4xf32, #tpu.memory_space<vmem>>, vector<1x16x16x4xf32>
    %33 = vector.shape_cast %32 : vector<1x16x16x4xf32> to vector<16x16x4xf32>
    %34 = vector.shape_cast %33 : vector<16x16x4xf32> to vector<256x4xf32>
    %c3 = arith.constant 3 : index
    %c0_23 = arith.constant 0 : index
    %c0_24 = arith.constant 0 : index
    %35 = vector.load %arg3[%c3, %c0_23, %c0_24] : memref<9x8x4xf32, #tpu.memory_space<vmem>>, vector<1x8x4xf32>
    %36 = vector.shape_cast %35 : vector<1x8x4xf32> to vector<8x4xf32>
    %cst_25 = arith.constant dense<0.000000e+00> : vector<8x256xf32>
    %37 = tpu.matmul %36, %34, %cst_25 {dimension_numbers = #tpu.dot_dimension_numbers<[1], [1], [0], [0], [0, 0, 1, 0], [], []>} : vector<8x4xf32>, vector<256x4xf32>, vector<8x256xf32> -> vector<8x256xf32>
    %38 = arith.addf %29, %37 : vector<8x256xf32>
    %c1_i32_26 = arith.constant 1 : i32
    %39 = arith.addi %1, %c1_i32_26 : i32
    %c0_27 = arith.constant 0 : index
    %40 = arith.index_cast %39 : i32 to index
    %c1_28 = arith.constant 1 : index
    %c0_29 = arith.constant 0 : index
    %41 = vector.load %arg2[%c0_27, %40, %c1_28, %c0_29] : memref<1x18x18x4xf32, #tpu.memory_space<vmem>>, vector<1x16x16x4xf32>
    %42 = vector.shape_cast %41 : vector<1x16x16x4xf32> to vector<16x16x4xf32>
    %43 = vector.shape_cast %42 : vector<16x16x4xf32> to vector<256x4xf32>
    %c4 = arith.constant 4 : index
    %c0_30 = arith.constant 0 : index
    %c0_31 = arith.constant 0 : index
    %44 = vector.load %arg3[%c4, %c0_30, %c0_31] : memref<9x8x4xf32, #tpu.memory_space<vmem>>, vector<1x8x4xf32>
    %45 = vector.shape_cast %44 : vector<1x8x4xf32> to vector<8x4xf32>
    %cst_32 = arith.constant dense<0.000000e+00> : vector<8x256xf32>
    %46 = tpu.matmul %45, %43, %cst_32 {dimension_numbers = #tpu.dot_dimension_numbers<[1], [1], [0], [0], [0, 0, 1, 0], [], []>} : vector<8x4xf32>, vector<256x4xf32>, vector<8x256xf32> -> vector<8x256xf32>
    %47 = arith.addf %38, %46 : vector<8x256xf32>
    %c1_i32_33 = arith.constant 1 : i32
    %48 = arith.addi %1, %c1_i32_33 : i32
    %c0_34 = arith.constant 0 : index
    %49 = arith.index_cast %48 : i32 to index
    %c2_35 = arith.constant 2 : index
    %c0_36 = arith.constant 0 : index
    %50 = vector.load %arg2[%c0_34, %49, %c2_35, %c0_36] : memref<1x18x18x4xf32, #tpu.memory_space<vmem>>, vector<1x16x16x4xf32>
    %51 = vector.shape_cast %50 : vector<1x16x16x4xf32> to vector<16x16x4xf32>
    %52 = vector.shape_cast %51 : vector<16x16x4xf32> to vector<256x4xf32>
    %c5 = arith.constant 5 : index
    %c0_37 = arith.constant 0 : index
    %c0_38 = arith.constant 0 : index
    %53 = vector.load %arg3[%c5, %c0_37, %c0_38] : memref<9x8x4xf32, #tpu.memory_space<vmem>>, vector<1x8x4xf32>
    %54 = vector.shape_cast %53 : vector<1x8x4xf32> to vector<8x4xf32>
    %cst_39 = arith.constant dense<0.000000e+00> : vector<8x256xf32>
    %55 = tpu.matmul %54, %52, %cst_39 {dimension_numbers = #tpu.dot_dimension_numbers<[1], [1], [0], [0], [0, 0, 1, 0], [], []>} : vector<8x4xf32>, vector<256x4xf32>, vector<8x256xf32> -> vector<8x256xf32>
    %56 = arith.addf %47, %55 : vector<8x256xf32>
    %c2_i32 = arith.constant 2 : i32
    %57 = arith.addi %1, %c2_i32 : i32
    %c0_40 = arith.constant 0 : index
    %58 = arith.index_cast %57 : i32 to index
    %c0_41 = arith.constant 0 : index
    %c0_42 = arith.constant 0 : index
    %59 = vector.load %arg2[%c0_40, %58, %c0_41, %c0_42] : memref<1x18x18x4xf32, #tpu.memory_space<vmem>>, vector<1x16x16x4xf32>
    %60 = vector.shape_cast %59 : vector<1x16x16x4xf32> to vector<16x16x4xf32>
    %61 = vector.shape_cast %60 : vector<16x16x4xf32> to vector<256x4xf32>
    %c6 = arith.constant 6 : index
    %c0_43 = arith.constant 0 : index
    %c0_44 = arith.constant 0 : index
    %62 = vector.load %arg3[%c6, %c0_43, %c0_44] : memref<9x8x4xf32, #tpu.memory_space<vmem>>, vector<1x8x4xf32>
    %63 = vector.shape_cast %62 : vector<1x8x4xf32> to vector<8x4xf32>
    %cst_45 = arith.constant dense<0.000000e+00> : vector<8x256xf32>
    %64 = tpu.matmul %63, %61, %cst_45 {dimension_numbers = #tpu.dot_dimension_numbers<[1], [1], [0], [0], [0, 0, 1, 0], [], []>} : vector<8x4xf32>, vector<256x4xf32>, vector<8x256xf32> -> vector<8x256xf32>
    %65 = arith.addf %56, %64 : vector<8x256xf32>
    %c2_i32_46 = arith.constant 2 : i32
    %66 = arith.addi %1, %c2_i32_46 : i32
    %c0_47 = arith.constant 0 : index
    %67 = arith.index_cast %66 : i32 to index
    %c1_48 = arith.constant 1 : index
    %c0_49 = arith.constant 0 : index
    %68 = vector.load %arg2[%c0_47, %67, %c1_48, %c0_49] : memref<1x18x18x4xf32, #tpu.memory_space<vmem>>, vector<1x16x16x4xf32>
    %69 = vector.shape_cast %68 : vector<1x16x16x4xf32> to vector<16x16x4xf32>
    %70 = vector.shape_cast %69 : vector<16x16x4xf32> to vector<256x4xf32>
    %c7 = arith.constant 7 : index
    %c0_50 = arith.constant 0 : index
    %c0_51 = arith.constant 0 : index
    %71 = vector.load %arg3[%c7, %c0_50, %c0_51] : memref<9x8x4xf32, #tpu.memory_space<vmem>>, vector<1x8x4xf32>
    %72 = vector.shape_cast %71 : vector<1x8x4xf32> to vector<8x4xf32>
    %cst_52 = arith.constant dense<0.000000e+00> : vector<8x256xf32>
    %73 = tpu.matmul %72, %70, %cst_52 {dimension_numbers = #tpu.dot_dimension_numbers<[1], [1], [0], [0], [0, 0, 1, 0], [], []>} : vector<8x4xf32>, vector<256x4xf32>, vector<8x256xf32> -> vector<8x256xf32>
    %74 = arith.addf %65, %73 : vector<8x256xf32>
    %c2_i32_53 = arith.constant 2 : i32
    %75 = arith.addi %1, %c2_i32_53 : i32
    %c0_54 = arith.constant 0 : index
    %76 = arith.index_cast %75 : i32 to index
    %c2_55 = arith.constant 2 : index
    %c0_56 = arith.constant 0 : index
    %77 = vector.load %arg2[%c0_54, %76, %c2_55, %c0_56] : memref<1x18x18x4xf32, #tpu.memory_space<vmem>>, vector<1x16x16x4xf32>
    %78 = vector.shape_cast %77 : vector<1x16x16x4xf32> to vector<16x16x4xf32>
    %79 = vector.shape_cast %78 : vector<16x16x4xf32> to vector<256x4xf32>
    %c8 = arith.constant 8 : index
    %c0_57 = arith.constant 0 : index
    %c0_58 = arith.constant 0 : index
    %80 = vector.load %arg3[%c8, %c0_57, %c0_58] : memref<9x8x4xf32, #tpu.memory_space<vmem>>, vector<1x8x4xf32>
    %81 = vector.shape_cast %80 : vector<1x8x4xf32> to vector<8x4xf32>
    %cst_59 = arith.constant dense<0.000000e+00> : vector<8x256xf32>
    %82 = tpu.matmul %81, %79, %cst_59 {dimension_numbers = #tpu.dot_dimension_numbers<[1], [1], [0], [0], [0, 0, 1, 0], [], []>} : vector<8x4xf32>, vector<256x4xf32>, vector<8x256xf32> -> vector<8x256xf32>
    %83 = arith.addf %74, %82 : vector<8x256xf32>
    %c0_60 = arith.constant 0 : index
    %c0_61 = arith.constant 0 : index
    %84 = vector.load %arg4[%c0_60, %c0_61] : memref<8x1xf32, #tpu.memory_space<vmem>>, vector<8x1xf32>
    %85 = vector.broadcast %84 : vector<8x1xf32> to vector<8x256xf32>
    %86 = arith.addf %83, %85 : vector<8x256xf32>
    %cst_62 = arith.constant 0.000000e+00 : f32
    %87 = vector.broadcast %cst_62 : f32 to vector<8x256xf32>
    %88 = arith.maximumf %86, %87 : vector<8x256xf32>
    %c0_63 = arith.constant 0 : index
    %c0_64 = arith.constant 0 : index
    %c0_65 = arith.constant 0 : index
    %89 = vector.load %arg5[%c0_63, %c0_64, %c0_65] : memref<1x8x256xf32, #tpu.memory_space<vmem>>, vector<1x8x256xf32>
    %90 = vector.shape_cast %89 : vector<1x8x256xf32> to vector<8x256xf32>
    %91 = vector.shape_cast %88 : vector<8x256xf32> to vector<1x8x256xf32>
    tpu.vector_store %arg5[%c0_63, %c0_64, %c0_65], %91 {strides = array<i32>} : memref<1x8x256xf32, #tpu.memory_space<vmem>>, vector<1x8x256xf32>,
    return
  }
  func.func @transform_0(%arg0: i32, %arg1: i32) -> (i32, i32, i32, i32) {
    %c0_i32 = arith.constant 0 : i32
    %c0_i32_0 = arith.constant 0 : i32
    %c0_i32_1 = arith.constant 0 : i32
    %c0_i32_2 = arith.constant 0 : i32
    return %arg0, %c0_i32, %c0_i32_0, %c0_i32_1 : i32, i32, i32, i32
  }
  func.func @transform_1(%arg0: i32, %arg1: i32) -> (i32, i32, i32) {
    %c0_i32 = arith.constant 0 : i32
    %c0_i32_0 = arith.constant 0 : i32
    %c0_i32_1 = arith.constant 0 : i32
    %c0_i32_2 = arith.constant 0 : i32
    return %c0_i32, %c0_i32_0, %c0_i32_1 : i32, i32, i32
  }
  func.func @transform_2(%arg0: i32, %arg1: i32) -> (i32, i32) {
    %c0_i32 = arith.constant 0 : i32
    %c0_i32_0 = arith.constant 0 : i32
    %c0_i32_1 = arith.constant 0 : i32
    return %c0_i32, %c0_i32_0 : i32, i32
  }
  func.func @transform_3(%arg0: i32, %arg1: i32) -> (i32, i32, i32) {
    %c0_i32 = arith.constant 0 : i32
    %c0_i32_0 = arith.constant 0 : i32
    return %arg0, %c0_i32, %arg1 : i32, i32, i32
  }
}

</mosaic_0001>

<bundles_post_ra>
// kernel: conv_layer.1
= control target key start
LH: loop header
LB: loop body
LE: loop exit
PB: predicated region body
PF: predicated region fallthrough
CT: control target
= control target key end

     0   :  { %s3490_s12 = smov 0   ;;  %s3492_s13 = smov 0   ;;  %s4218_s0 = inlined_call_operand.vmem [shape: f32[2,18,18,4], index: 0, kind: input, shape index: {}]   ;;  %s4219_s1 = inlined_call_operand.vmem [shape: f32[9,8,4], index: 1, kind: input, shape index: {}]   ;;  %s4220_s2 = inlined_call_operand.vmem [shape: f32[8,1], index: 2, kind: input, shape index: {}]   ;;  %s4221_s3 = inlined_call_operand.vmem [shape: f32[2,8,256], index: 3, kind: output, shape index: {}]  }
   0x1   :  { %s3494_s14 = smov 0  }
   0x2 LB: > { %s25_s15 = sadd.s32 1, %s3463_s13  ;;  %p2160_p0 = scmp.ge.s32.totalorder %s3467_s14, 1  ;;  %s3467_s14 = sphi %s3494_s14, %s13_s14   ;;  %s3463_s13 = sphi %s3492_s13, %s4225_s13   ;;  %s3459_s12 = sphi %s3490_s12, %s4224_s12  }
   0x3   : > { %p27_p1 = scmp.ge.s32.totalorder %s25_s15, 2  ;;  %p151_p2 = scmp.lt.s32.totalorder %s3467_s14, 3 }
   0x5   : > { %s4227_s15 = smov (%p27_p1, %s25_s15), 0  ;;  %p152_p3 = pnand %p2160_p0, %p151_p2 }
   0x6   : > { %p179_p4 = scmp.lt.s32.totalorder (!%p152_p3), %s3459_s12, 1  ;;  %vm264_vm0 = vcmask (!%p152_p3), 31744   ;;  %v3511_v0 = vld [vmem:[%s4219_s1 + $0x8] sm:$0xff] (!%p152_p3)  ;;  %v3516_v1 = vld [vmem:[%s4219_s1 + $0x20] sm:$0xff] (!%p152_p3) }
   0x7   : > { %155 = sbr.rel (%p152_p3) target bundleno = 563 (0x233), region = 32  ;;  %2696 = vmatprep.mubr.msk.f32.mxu1 (!%p152_p3), %vm264_vm0, %v3511_v0  ;;  %2832 = vmatprep.mubr.msk.f32.mxu0 (!%p152_p3), %vm264_vm0, %v3516_v1  ;;  %vm3532_vm1 = vmpackc.low (!%p152_p3), %vm264_vm0, %vm264_vm0 }
   0xe   : > { %s4229_s12 = smov (!%p179_p4, %s3459_s12), 1 }
   0xf   : > { %s3418_s20 = smul.u32 432, %s4229_s12  ;;  %s2663_s17 = sshll.u32 %s4229_s12, 4 }
  0x11   : > { %s3528_s23 = scalar_lea.vmem %s4218_s0, %s3418_s20  ;;  %s192_s20 = scalar_lea.vmem %s4221_s3, %s2663_s17 }
  0x12   : > { %v246_v3 = vld [vmem:[%s3528_s23 + $0xc1] sm:$0xff]  ;;  %v247_v4 = vld [vmem:[%s3528_s23 + $0xc9] sm:$0xff]  ;;  %v2347_v5 = vld [vmem:[%s3528_s23 + $0xd9] sm:$0xff] }
  0x13   : > { %v3539_v6 = vpack.c.bf16 %v247_v4, %v246_v3  ;;  %v2348_v7 = vld [vmem:[%s3528_s23 + $0xe1] sm:$0xff]  ;;  %v231_v9 = vld [vmem:[%s3528_s23 + $0x9] sm:$0xff]  ;;  %v2331_v12 = vld [vmem:[%s3528_s23 + $0x19] sm:$0xff] }
  0x14   : > { %v230_v8 = vld [vmem:[%s3528_s23 + $0x1] sm:$0xff]  ;;  %v3162_v10 = vpack.c.bf16 %v2348_v7, %v2347_v5  ;;  %v2349_v14 = vld [vmem:[%s3528_s23 + $0xf1] sm:$0xff]  ;;  %v2350_v16 = vld [vmem:[%s3528_s23 + $0xf9] sm:$0xff] }
  0x15   : > { %v2973_v11 = vpack.c.bf16 %v231_v9, %v230_v8  ;;  %v2332_v13 = vld [vmem:[%s3528_s23 + $0x21] sm:$0xff]  ;;  %2972 = vmatprep.subr.msk.bf16.mxu1 %vm3532_vm1, %v3539_v6  ;;  %v3555_v17 = vpack.c.bf16 %v2350_v16, %v2349_v14  ;;  %v2333_v18 = vld [vmem:[%s3528_s23 + $0x31] sm:$0xff]  ;;  %v2334_v19 = vld [vmem:[%s3528_s23 + $0x39] sm:$0xff] }
  0x16   : > { %v3165_v15 = vpack.c.bf16 %v2332_v13, %v2331_v12  ;;  %3164 = vmatprep.subr.msk.bf16.mxu0 %vm3532_vm1, %v3162_v10  ;;  %v2351_v20 = vld [vmem:[%s3528_s23 + $0x109] sm:$0xff]  ;;  %v2352_v21 = vld [vmem:[%s3528_s23 + $0x111] sm:$0xff]  ;;  %v3568_v22 = vpack.c.bf16 %v2334_v19, %v2333_v18  ;;  %v2353_v26 = vld [vmem:[%s3528_s23 + $0x121] sm:$0xff] }
  0x17   : > { %2975 = vmatpush3.bf16.xpose.msk.msra.mxu1 %vm3532_vm1, %v2973_v11  ;;  %v3570_v23 = vpack.c.bf16 %v2352_v21, %v2351_v20  ;;  %v2335_v24 = vld [vmem:[%s3528_s23 + $0x49] sm:$0xff]  ;;  %v2336_v25 = vld [vmem:[%s3528_s23 + $0x51] sm:$0xff]  ;;  %v2337_v30 = vld [vmem:[%s3528_s23 + $0x61] sm:$0xff] }
  0x18   : > { %3167 = vmatpush3.bf16.xpose.msk.msra.mxu0 %vm3532_vm1, %v3165_v15  ;;  %2978 = vmatprep.subr.msk.bf16.mxu1 %vm3532_vm1, %v3162_v10  ;;  %v2354_v27 = vld [vmem:[%s3528_s23 + $0x129] sm:$0xff]  ;;  %v3587_v28 = vpack.c.bf16 %v2336_v25, %v2335_v24  ;;  %v2355_v32 = vld [vmem:[%s3528_s23 + $0x139] sm:$0xff]  ;;  %v2356_v33 = vld [vmem:[%s3528_s23 + $0x141] sm:$0xff] }
  0x19   : > { %3170 = vmatprep.subr.msk.bf16.mxu0 %vm3532_vm1, %v3555_v17  ;;  %v3589_v29 = vpack.c.bf16 %v2354_v27, %v2353_v26  ;;  %v2338_v31 = vld [vmem:[%s3528_s23 + $0x69] sm:$0xff]  ;;  %v3609_v35 = vpack.c.bf16 %v2356_v33, %v2355_v32  ;;  %v2339_v36 = vld [vmem:[%s3528_s23 + $0x79] sm:$0xff]  ;;  %v2340_v37 = vld [vmem:[%s3528_s23 + $0x81] sm:$0xff] }
  0x1a   : > { %v3607_v34 = vpack.c.bf16 %v2338_v31, %v2337_v30  ;;  %v2357_v38 = vld [vmem:[%s3528_s23 + $0x151] sm:$0xff]  ;;  %v2358_v39 = vld [vmem:[%s3528_s23 + $0x159] sm:$0xff]  ;;  %v3627_v40 = vpack.c.bf16 %v2340_v37, %v2339_v36  ;;  %v2359_v44 = vld [vmem:[%s3528_s23 + $0x169] sm:$0xff] }
  0x1b   : > { %v3629_v41 = vpack.c.bf16 %v2358_v39, %v2357_v38  ;;  %v2341_v42 = vld [vmem:[%s3528_s23 + $0x91] sm:$0xff]  ;;  %v2342_v43 = vld [vmem:[%s3528_s23 + $0x99] sm:$0xff]  ;;  %v2343_v48 = vld [vmem:[%s3528_s23 + $0xa9] sm:$0xff] }
  0x1c   : > { %v2360_v45 = vld [vmem:[%s3528_s23 + $0x171] sm:$0xff]  ;;  %v3647_v46 = vpack.c.bf16 %v2342_v43, %v2341_v42  ;;  %v2361_v50 = vld [vmem:[%s3528_s23 + $0x181] sm:$0xff]  ;;  %v2362_v51 = vld [vmem:[%s3528_s23 + $0x189] sm:$0xff] }
  0x1d   : > { %v3649_v47 = vpack.c.bf16 %v2360_v45, %v2359_v44  ;;  %v2344_v49 = vld [vmem:[%s3528_s23 + $0xb1] sm:$0xff]  ;;  %v3669_v53 = vpack.c.bf16 %v2362_v51, %v2361_v50  ;;  %v213_v54 = vld [vmem:[%s3528_s23 + $0xc0] sm:$0xff]  ;;  %v214_v55 = vld [vmem:[%s3528_s23 + $0xc8] sm:$0xff] }
  0x1e   : > { %v3667_v52 = vpack.c.bf16 %v2344_v49, %v2343_v48  ;;  %v2413_v56 = vld [vmem:[%s3528_s23 + $0xda] sm:$0xff]  ;;  %v2414_v57 = vld [vmem:[%s3528_s23 + $0xe2] sm:$0xff]  ;;  %v3687_v58 = vpack.c.bf16 %v214_v55, %v213_v54  ;;  %v2415_v5 = vld [vmem:[%s3528_s23 + $0xf2] sm:$0xff] }
  0x1f   : > { %2981 = vmatpush3.bf16.xpose.msk.msra.mxu1 %vm3532_vm1, %v3165_v15  ;;  %v3689_v59 = vpack.c.bf16 %v2414_v57, %v2413_v56  ;;  %v197_v60 = vld [vmem:[%s3528_s23] sm:$0xff]  ;;  %v198_v61 = vld [vmem:[%s3528_s23 + $0x8] sm:$0xff]  ;;  %v215_v3 = vld [vmem:[%s3528_s23 + $0xd8] sm:$0xff] }
  0x20   : > { %3173 = vmatpush3.bf16.xpose.msk.msra.mxu0 %vm3532_vm1, %v3568_v22  ;;  %2984 = vmatprep.subr.msk.bf16.mxu1 %vm3532_vm1, %v3555_v17  ;;  %v2397_v62 = vld [vmem:[%s3528_s23 + $0x1a] sm:$0xff]  ;;  %v2398_v63 = vld [vmem:[%s3528_s23 + $0x22] sm:$0xff]  ;;  %v3021_v8 = vpack.c.bf16 %v198_v61, %v197_v60  ;;  %v2399_v15 = vld [vmem:[%s3528_s23 + $0x32] sm:$0xff] }
  0x21   : > { %3176 = vmatprep.subr.msk.bf16.mxu0 %vm3532_vm1, %v3570_v23  ;;  %v216_v4 = vld [vmem:[%s3528_s23 + $0xe0] sm:$0xff]  ;;  %v3711_v9 = vpack.c.bf16 %v2398_v63, %v2397_v62  ;;  %v3731_v13 = vld [vmem:[%s4219_s1 + $0x28] sm:$0xff]  ;;  %v217_v16 = vld [vmem:[%s3528_s23 + $0xf0] sm:$0xff] }
  0x22   : > { %v2416_v7 = vld [vmem:[%s3528_s23 + $0xfa] sm:$0xff]  ;;  %v3713_v10 = vpack.c.bf16 %v216_v4, %v215_v3  ;;  %v2417_v19 = vld [vmem:[%s3528_s23 + $0x10a] sm:$0xff]  ;;  %v2418_v20 = vld [vmem:[%s3528_s23 + $0x112] sm:$0xff] }
  0x23   : > { %v3715_v11 = vpack.c.bf16 %v2416_v7, %v2415_v5  ;;  %v3722_v12 = vld [vmem:[%s4219_s1] sm:$0xff]  ;;  %v218_v18 = vld [vmem:[%s3528_s23 + $0xf8] sm:$0xff]  ;;  %v3760_v26 = vpack.c.bf16 %v2418_v20, %v2417_v19  ;;  %v201_v27 = vld [vmem:[%s3528_s23 + $0x30] sm:$0xff] }
  0x24   : > { %v200_v14 = vld [vmem:[%s3528_s23 + $0x20] sm:$0xff]  ;;  %v3758_v25 = vpack.c.bf16 %v218_v18, %v217_v16  ;;  %v202_v30 = vld [vmem:[%s3528_s23 + $0x38] sm:$0xff]  ;;  %v2401_v31 = vld [vmem:[%s3528_s23 + $0x4a] sm:$0xff] }
  0x25   : > { %v2402_v32 = vld [vmem:[%s3528_s23 + $0x52] sm:$0xff]  ;;  %v219_v33 = vld [vmem:[%s3528_s23 + $0x108] sm:$0xff]  ;;  %v3782_v39 = vpack.c.bf16 %v202_v30, %v201_v27  ;;  %v221_v51 = vld [vmem:[%s3528_s23 + $0x120] sm:$0xff] }
  0x26   : > { %v220_v36 = vld [vmem:[%s3528_s23 + $0x110] sm:$0xff]  ;;  %v2419_v37 = vld [vmem:[%s3528_s23 + $0x122] sm:$0xff]  ;;  %v3784_v42 = vpack.c.bf16 %v2402_v32, %v2401_v31  ;;  %v2421_v55 = vld [vmem:[%s3528_s23 + $0x13a] sm:$0xff] }
  0x27   : > { %2987 = vmatpush3.bf16.xpose.msk.msra.mxu1 %vm3532_vm1, %v3568_v22  ;;  %v2420_v38 = vld [vmem:[%s3528_s23 + $0x12a] sm:$0xff]  ;;  %v3786_v43 = vpack.c.bf16 %v220_v36, %v219_v33  ;;  %v2403_v49 = vld [vmem:[%s3528_s23 + $0x62] sm:$0xff]  ;;  %v2405_v4 = vld [vmem:[%s3528_s23 + $0x7a] sm:$0xff] }
  0x28   : > { %3179 = vmatpush3.bf16.xpose.msk.msra.mxu0 %vm3532_vm1, %v3587_v28  ;;  %2990 = vmatprep.subr.msk.bf16.mxu1 %vm3532_vm1, %v3570_v23  ;;  %v3788_v44 = vpack.c.bf16 %v2420_v38, %v2419_v37  ;;  %v203_v45 = vld [vmem:[%s3528_s23 + $0x48] sm:$0xff]  ;;  %v204_v48 = vld [vmem:[%s3528_s23 + $0x50] sm:$0xff]  ;;  %v205_v63 = vld [vmem:[%s3528_s23 + $0x60] sm:$0xff] }
  0x29   : > { %3182 = vmatprep.subr.msk.bf16.mxu0 %vm3532_vm1, %v3589_v29  ;;  %v2404_v50 = vld [vmem:[%s3528_s23 + $0x6a] sm:$0xff]  ;;  %v2422_v56 = vld [vmem:[%s3528_s23 + $0x142] sm:$0xff]  ;;  %v3810_v57 = vpack.c.bf16 %v204_v48, %v203_v45  ;;  %v223_v7 = vld [vmem:[%s3528_s23 + $0x138] sm:$0xff] }
  0x2a   : > { %v222_v54 = vld [vmem:[%s3528_s23 + $0x128] sm:$0xff]  ;;  %v3812_v60 = vpack.c.bf16 %v2404_v50, %v2403_v49  ;;  %v3816_v62 = vpack.c.bf16 %v2422_v56, %v2421_v55  ;;  %v207_v19 = vld [vmem:[%s3528_s23 + $0x78] sm:$0xff]  ;;  %v208_v20 = vld [vmem:[%s3528_s23 + $0x80] sm:$0xff] }
  0x2b   : > { %v3814_v61 = vpack.c.bf16 %v222_v54, %v221_v51  ;;  %v206_v3 = vld [vmem:[%s3528_s23 + $0x68] sm:$0xff]  ;;  %v2407_v27 = vld [vmem:[%s3528_s23 + $0x92] sm:$0xff]  ;;  %v2408_v30 = vld [vmem:[%s3528_s23 + $0x9a] sm:$0xff]  ;;  %v3866_v37 = vpack.c.bf16 %v208_v20, %v207_v19 }
  0x2c   : > { %v2406_v5 = vld [vmem:[%s3528_s23 + $0x82] sm:$0xff]  ;;  %v225_v31 = vld [vmem:[%s3528_s23 + $0x150] sm:$0xff]  ;;  %v226_v32 = vld [vmem:[%s3528_s23 + $0x158] sm:$0xff]  ;;  %v3868_v38 = vpack.c.bf16 %v2408_v30, %v2407_v27 }
  0x2d   : > { %v2425_v33 = vld [vmem:[%s3528_s23 + $0x16a] sm:$0xff]  ;;  %v2426_v36 = vld [vmem:[%s3528_s23 + $0x172] sm:$0xff]  ;;  %v3870_v45 = vpack.c.bf16 %v226_v32, %v225_v31  ;;  %v2411_v19 = vld [vmem:[%s3528_s23 + $0xc2] sm:$0xff] }
  0x2e   : > { %v3872_v48 = vpack.c.bf16 %v2426_v36, %v2425_v33  ;;  %v209_v49 = vld [vmem:[%s3528_s23 + $0x90] sm:$0xff]  ;;  %v210_v50 = vld [vmem:[%s3528_s23 + $0x98] sm:$0xff]  ;;  %v227_v55 = vld [vmem:[%s3528_s23 + $0x168] sm:$0xff] }
  0x2f   : > { %2993 = vmatpush3.bf16.xpose.msk.msra.mxu1 %vm3532_vm1, %v3587_v28  ;;  %v2409_v51 = vld [vmem:[%s3528_s23 + $0xaa] sm:$0xff]  ;;  %v2410_v54 = vld [vmem:[%s3528_s23 + $0xb2] sm:$0xff]  ;;  %v605_v31 = vld [vmem:[%s3528_s23 + $0x2] sm:$0xff] }
  0x30   : > { %3185 = vmatpush3.bf16.xpose.msk.msra.mxu0 %vm3532_vm1, %v3607_v34  ;;  %2996 = vmatprep.subr.msk.bf16.mxu1 %vm3532_vm1, %v3589_v29  ;;  %v228_v56 = vld [vmem:[%s3528_s23 + $0x170] sm:$0xff] }
  0x31   : > { %3188 = vmatprep.subr.msk.bf16.mxu0 %vm3532_vm1, %v3609_v35  ;;  %v2412_v20 = vld [vmem:[%s3528_s23 + $0xca] sm:$0xff] }
  0x32   : > { %v3920_v30 = vpack.c.bf16 %v2412_v20, %v2411_v19  ;;  %v606_v32 = vld [vmem:[%s3528_s23 + $0xa] sm:$0xff] }
  0x33   : > { %v3069_v33 = vpack.c.bf16 %v606_v32, %v605_v31  ;;  %v2231_v36 = vld [vmem:[%s4219_s1 + $0x10] sm:$0xff] }
  0x37   : > { %2999 = vmatpush3.bf16.xpose.msk.msra.mxu1 %vm3532_vm1, %v3607_v34 }
  0x38   : > { %3191 = vmatpush3.bf16.xpose.msk.msra.mxu0 %vm3532_vm1, %v3627_v40  ;;  %3002 = vmatprep.subr.msk.bf16.mxu1 %vm3532_vm1, %v3609_v35 }
  0x39   : > { %3194 = vmatprep.subr.msk.bf16.mxu0 %vm3532_vm1, %v3629_v41 }
  0x3f   : > { %3005 = vmatpush3.bf16.xpose.msk.msra.mxu1 %vm3532_vm1, %v3627_v40 }
  0x40   : > { %3197 = vmatpush3.bf16.xpose.msk.msra.mxu0 %vm3532_vm1, %v3647_v46  ;;  %3008 = vmatprep.subr.msk.bf16.mxu1 %vm3532_vm1, %v3629_v41 }
  0x41   : > { %3200 = vmatprep.subr.msk.bf16.mxu0 %vm3532_vm1, %v3649_v47 }
  0x47   : > { %3011 = vmatpush3.bf16.xpose.msk.msra.mxu1 %vm3532_vm1, %v3647_v46 }
  0x48   : > { %3203 = vmatpush3.bf16.xpose.msk.msra.mxu0 %vm3532_vm1, %v3667_v52  ;;  %3014 = vmatprep.subr.msk.bf16.mxu1 %vm3532_vm1, %v3649_v47 }
  0x49   : > { %3206 = vmatprep.subr.msk.bf16.mxu0 %vm3532_vm1, %v3669_v53 }
  0x4f   : > { %3017 = vmatpush3.bf16.xpose.msk.msra.mxu1 %vm3532_vm1, %v3667_v52 }
  0x50   : > { %3209 = vmatpush3.bf16.xpose.msk.msra.mxu0 %vm3532_vm1, %v3539_v6  ;;  %3020 = vmatprep.subr.msk.bf16.mxu1 %vm3532_vm1, %v3687_v58 }
  0x51   : > { %3212 = vmatprep.subr.msk.bf16.mxu0 %vm3532_vm1, %v3689_v59 }
  0x56   : > { %2697 = vmatmul.mubr.msk.f32.vlgmr.msra.gmra.mrb[0].mxu1 %vm264_vm0, %v3511_v0  ;;  %v199_v0 = vld [vmem:[%s3528_s23 + $0x18] sm:$0xff] }
  0x57   : > { %3023 = vmatpush3.bf16.xpose.msk.msra.mxu1 %vm3532_vm1, %v3021_v8  ;;  %2833 = vmatmul.mubr.msk.f32.vlgmr.msra.gmra.mrb[0].mxu0 %vm264_vm0, %v3516_v1  ;;  %v2400_v1 = vld [vmem:[%s3528_s23 + $0x3a] sm:$0xff]  ;;  %v3754_v21 = vpack.c.bf16 %v200_v14, %v199_v0  ;;  %v2423_v0 = vld [vmem:[%s3528_s23 + $0x152] sm:$0xff] }
  0x58   : > { %3215 = vmatpush3.bf16.xpose.msk.msra.mxu0 %vm3532_vm1, %v3711_v9  ;;  %3026 = vmatprep.subr.msk.bf16.mxu1 %vm3532_vm1, %v3713_v10  ;;  %v3756_v24 = vpack.c.bf16 %v2400_v1, %v2399_v15  ;;  %v224_v8 = vld [vmem:[%s3528_s23 + $0x140] sm:$0xff]  ;;  %v3838_v15 = vpack.c.bf16 %v206_v3, %v205_v63  ;;  %v3840_v1 = vpack.c.bf16 %v2406_v5, %v2405_v4  ;;  %v2428_v3 = vld [vmem:[%s3528_s23 + $0x18a] sm:$0xff] }
  0x59   : > { %3218 = vmatprep.subr.msk.bf16.mxu0 %vm3532_vm1, %v3715_v11  ;;  %2730 = vmatprep.mubr.msk.f32.mxu1 %vm264_vm0, %v3722_v12  ;;  %v2424_v14 = vld [vmem:[%s3528_s23 + $0x15a] sm:$0xff]  ;;  %v3842_v16 = vpack.c.bf16 %v224_v8, %v223_v7  ;;  %v2427_v63 = vld [vmem:[%s3528_s23 + $0x182] sm:$0xff]  ;;  %v3894_v4 = vpack.c.bf16 %v210_v50, %v209_v49  ;;  %v3896_v5 = vpack.c.bf16 %v2410_v54, %v2409_v51  ;;  %v2495_v49 = vld [vmem:[%s4219_s1 + $0x30] sm:$0xff] }
  0x5a   : > { %2866 = vmatprep.mubr.msk.f32.mxu0 %vm264_vm0, %v3731_v13  ;;  %v3844_v18 = vpack.c.bf16 %v2424_v14, %v2423_v0  ;;  %v3898_v7 = vpack.c.bf16 %v228_v56, %v227_v55  ;;  %v3900_v8 = vpack.c.bf16 %v2428_v3, %v2427_v63  ;;  %v211_v0 = vld [vmem:[%s3528_s23 + $0xa8] sm:$0xff]  ;;  %v212_v14 = vld [vmem:[%s3528_s23 + $0xb0] sm:$0xff]  ;;  %v2493_v50 = vld [vmem:[%s3528_s23 + $0x198] sm:$0xff] }
  0x5b   : > { %v3918_v27 = vpack.c.bf16 %v212_v14, %v211_v0  ;;  %v2494_v51 = vld [vmem:[%s3528_s23 + $0x1a0] sm:$0xff]  ;;  %v2297_v55 = vld [vmem:[%s4219_s1 + $0x18] sm:$0xff] }
  0x5c   : > { %v3300_v54 = vpack.c.bf16 %v2494_v51, %v2493_v50 }
  0x5f   : > { %3029 = vmatpush3.bf16.xpose.msk.msra.mxu1 %vm3532_vm1, %v3754_v21 }
  0x60   : > { %3221 = vmatpush3.bf16.xpose.msk.msra.mxu0 %vm3532_vm1, %v3756_v24  ;;  %3032 = vmatprep.subr.msk.bf16.mxu1 %vm3532_vm1, %v3758_v25 }
  0x61   : > { %3224 = vmatprep.subr.msk.bf16.mxu0 %vm3532_vm1, %v3760_v26 }
  0x67   : > { %3035 = vmatpush3.bf16.xpose.msk.msra.mxu1 %vm3532_vm1, %v3782_v39 }
  0x68   : > { %3227 = vmatpush3.bf16.xpose.msk.msra.mxu0 %vm3532_vm1, %v3784_v42  ;;  %3038 = vmatprep.subr.msk.bf16.mxu1 %vm3532_vm1, %v3786_v43 }
  0x69   : > { %3230 = vmatprep.subr.msk.bf16.mxu0 %vm3532_vm1, %v3788_v44 }
  0x6f   : > { %3041 = vmatpush3.bf16.xpose.msk.msra.mxu1 %vm3532_vm1, %v3810_v57 }
  0x70   : > { %3233 = vmatpush3.bf16.xpose.msk.msra.mxu0 %vm3532_vm1, %v3812_v60  ;;  %3044 = vmatprep.subr.msk.bf16.mxu1 %vm3532_vm1, %v3814_v61 }
  0x71   : > { %3236 = vmatprep.subr.msk.bf16.mxu0 %vm3532_vm1, %v3816_v62 }
  0x77   : > { %3047 = vmatpush3.bf16.xpose.msk.msra.mxu1 %vm3532_vm1, %v3838_v15 }
  0x78   : > { %3239 = vmatpush3.bf16.xpose.msk.msra.mxu0 %vm3532_vm1, %v3840_v1  ;;  %3050 = vmatprep.subr.msk.bf16.mxu1 %vm3532_vm1, %v3842_v16 }
  0x79   : > { %3242 = vmatprep.subr.msk.bf16.mxu0 %vm3532_vm1, %v3844_v18 }
  0x7f   : > { %3053 = vmatpush3.bf16.xpose.msk.msra.mxu1 %vm3532_vm1, %v3866_v37 }
  0x80   : > { %3245 = vmatpush3.bf16.xpose.msk.msra.mxu0 %vm3532_vm1, %v3868_v38  ;;  %3056 = vmatprep.subr.msk.bf16.mxu1 %vm3532_vm1, %v3870_v45 }
  0x81   : > { %3248 = vmatprep.subr.msk.bf16.mxu0 %vm3532_vm1, %v3872_v48 }
  0x87   : > { %3059 = vmatpush3.bf16.xpose.msk.msra.mxu1 %vm3532_vm1, %v3894_v4 }
  0x88   : > { %3251 = vmatpush3.bf16.xpose.msk.msra.mxu0 %vm3532_vm1, %v3896_v5  ;;  %3062 = vmatprep.subr.msk.bf16.mxu1 %vm3532_vm1, %v3898_v7 }
  0x89   : > { %3254 = vmatprep.subr.msk.bf16.mxu0 %vm3532_vm1, %v3900_v8 }
  0x8f   : > { %3065 = vmatpush3.bf16.xpose.msk.msra.mxu1 %vm3532_vm1, %v3918_v27 }
  0x90   : > { %3257 = vmatpush3.bf16.xpose.msk.msra.mxu0 %vm3532_vm1, %v3920_v30  ;;  %3068 = vmatprep.subr.msk.bf16.mxu1 %vm3532_vm1, %v3920_v30 }
  0x91   : > { %3260 = vmatprep.subr.msk.bf16.mxu0 %vm3532_vm1, %v3758_v25 }
  0x96   : > { %2731 = vmatmul.mubr.msk.f32.vlgmr.msra.gmra.mrb[0].mxu1 %vm264_vm0, %v3722_v12  ;;  %v2492_v12 = vld [vmem:[%s3528_s23 + $0x188] sm:$0xff] }
  0x97   : > { %3071 = vmatpush3.bf16.xpose.msk.msra.mxu1 %vm3532_vm1, %v3069_v33  ;;  %2867 = vmatmul.mubr.msk.f32.vlgmr.msra.gmra.mrb[0].mxu0 %vm264_vm0, %v3731_v13 }
  0x98   : > { %3263 = vmatpush3.bf16.xpose.msk.msra.mxu0 %vm3532_vm1, %v3782_v39  ;;  %3074 = vmatprep.subr.msk.bf16.mxu1 %vm3532_vm1, %v3689_v59 }
  0x99   : > { %3266 = vmatprep.subr.msk.bf16.mxu0 %vm3532_vm1, %v3786_v43  ;;  %2764 = vmatprep.mubr.msk.f32.mxu1 %vm264_vm0, %v2231_v36 }
  0x9a   : > { %2900 = vmatprep.mubr.msk.f32.mxu0 %vm264_vm0, %v2495_v49 }
  0x9f   : > { %3077 = vmatpush3.bf16.xpose.msk.msra.mxu1 %vm3532_vm1, %v3711_v9  ;;  %v2491_v9 = vld [vmem:[%s3528_s23 + $0x180] sm:$0xff] }
  0xa0   : > { %3269 = vmatpush3.bf16.xpose.msk.msra.mxu0 %vm3532_vm1, %v3810_v57  ;;  %3080 = vmatprep.subr.msk.bf16.mxu1 %vm3532_vm1, %v3715_v11  ;;  %v3294_v13 = vpack.c.bf16 %v2492_v12, %v2491_v9 }
  0xa1   : > { %3272 = vmatprep.subr.msk.bf16.mxu0 %vm3532_vm1, %v3814_v61 }
  0xa7   : > { %3083 = vmatpush3.bf16.xpose.msk.msra.mxu1 %vm3532_vm1, %v3756_v24 }
  0xa8   : > { %3275 = vmatpush3.bf16.xpose.msk.msra.mxu0 %vm3532_vm1, %v3838_v15  ;;  %3086 = vmatprep.subr.msk.bf16.mxu1 %vm3532_vm1, %v3760_v26 }
  0xa9   : > { %3278 = vmatprep.subr.msk.bf16.mxu0 %vm3532_vm1, %v3842_v16 }
  0xaf   : > { %3089 = vmatpush3.bf16.xpose.msk.msra.mxu1 %vm3532_vm1, %v3784_v42 }
  0xb0   : > { %3281 = vmatpush3.bf16.xpose.msk.msra.mxu0 %vm3532_vm1, %v3866_v37  ;;  %3092 = vmatprep.subr.msk.bf16.mxu1 %vm3532_vm1, %v3788_v44 }
  0xb1   : > { %3284 = vmatprep.subr.msk.bf16.mxu0 %vm3532_vm1, %v3870_v45 }
  0xb7   : > { %3095 = vmatpush3.bf16.xpose.msk.msra.mxu1 %vm3532_vm1, %v3812_v60 }
  0xb8   : > { %3287 = vmatpush3.bf16.xpose.msk.msra.mxu0 %vm3532_vm1, %v3894_v4  ;;  %3098 = vmatprep.subr.msk.bf16.mxu1 %vm3532_vm1, %v3816_v62 }
  0xb9   : > { %3290 = vmatprep.subr.msk.bf16.mxu0 %vm3532_vm1, %v3898_v7 }
  0xbf   : > { %3101 = vmatpush3.bf16.xpose.msk.msra.mxu1 %vm3532_vm1, %v3840_v1 }
  0xc0   : > { %3293 = vmatpush3.bf16.xpose.msk.msra.mxu0 %vm3532_vm1, %v3918_v27  ;;  %3104 = vmatprep.subr.msk.bf16.mxu1 %vm3532_vm1, %v3844_v18 }
  0xc1   : > { %3296 = vmatprep.subr.msk.bf16.mxu0 %vm3532_vm1, %v3294_v13 }
  0xc7   : > { %3107 = vmatpush3.bf16.xpose.msk.msra.mxu1 %vm3532_vm1, %v3868_v38 }
  0xc8   : > { %3299 = vmatpush3.bf16.xpose.msk.msra.mxu0 %vm3532_vm1, %v3687_v58  ;;  %3110 = vmatprep.subr.msk.bf16.mxu1 %vm3532_vm1, %v3872_v48 }
  0xc9   : > { %3302 = vmatprep.subr.msk.bf16.mxu0 %vm3532_vm1, %v3300_v54 }
  0xcf   : > { %3113 = vmatpush3.bf16.xpose.msk.msra.mxu1 %vm3532_vm1, %v3896_v5 }
  0xd0   : > { %3305 = vmatpush3.bf16.xpose.msk.msra.mxu0 %vm3532_vm1, %v3713_v10  ;;  %3116 = vmatprep.subr.msk.bf16.mxu1 %vm3532_vm1, %v3713_v10  ;;  %v2561_v10 = vld [vmem:[%s4219_s1 + $0x38] sm:$0xff] }
  0xd1   : > { %3308 = vmatprep.subr.msk.bf16.mxu0 %vm3532_vm1, %v3555_v17  ;;  %v2053_v17 = vld [vmem:[%s4220_s2] sm:$0xff] }
  0xd6   : > { %2765 = vmatmul.mubr.msk.f32.vlgmr.msra.gmra.mrb[0].mxu1 %vm264_vm0, %v2231_v36 }
  0xd7   : > { %3119 = vmatpush3.bf16.xpose.msk.msra.mxu1 %vm3532_vm1, %v3754_v21  ;;  %2901 = vmatmul.mubr.msk.f32.vlgmr.msra.gmra.mrb[0].mxu0 %vm264_vm0, %v2495_v49  ;;  %v3469_v21 = vmov 0  }
  0xd8   : > { %3311 = vmatpush3.bf16.xpose.msk.msra.mxu0 %vm3532_vm1, %v3568_v22  ;;  %3122 = vmatprep.subr.msk.bf16.mxu1 %vm3532_vm1, %v3758_v25  ;;  %v2559_v22 = vld [vmem:[%s3528_s23 + $0x199] sm:$0xff] }
  0xd9   : > { %3314 = vmatprep.subr.msk.bf16.mxu0 %vm3532_vm1, %v3570_v23  ;;  %2798 = vmatprep.mubr.msk.f32.mxu1 %vm264_vm0, %v2297_v55  ;;  %v2560_v23 = vld [vmem:[%s3528_s23 + $0x1a1] sm:$0xff] }
  0xda   : > { %2934 = vmatprep.mubr.msk.f32.mxu0 %vm264_vm0, %v2561_v10  ;;  %3444 = vset.pattern.permute.xlu0 %v3469_v21 }
  0xdb   : > { %2056 = vperm.xlu0 %3444, %v2053_v17  }
  0xdf   : > { %3125 = vmatpush3.bf16.xpose.msk.msra.mxu1 %vm3532_vm1, %v3782_v39 }
  0xe0   : > { %3317 = vmatpush3.bf16.xpose.msk.msra.mxu0 %vm3532_vm1, %v3587_v28  ;;  %3128 = vmatprep.subr.msk.bf16.mxu1 %vm3532_vm1, %v3786_v43  ;;  %v3348_v28 = vpack.c.bf16 %v2560_v23, %v2559_v22 }
  0xe1   : > { %3320 = vmatprep.subr.msk.bf16.mxu0 %vm3532_vm1, %v3589_v29  ;;  %v2543_v29 = vld [vmem:[%s3528_s23 + $0xd9] sm:$0xff] }
  0xe7   : > { %3131 = vmatpush3.bf16.xpose.msk.msra.mxu1 %vm3532_vm1, %v3810_v57 }
  0xe8   : > { %3323 = vmatpush3.bf16.xpose.msk.msra.mxu0 %vm3532_vm1, %v3607_v34  ;;  %3134 = vmatprep.subr.msk.bf16.mxu1 %vm3532_vm1, %v3814_v61  ;;  %v2544_v34 = vld [vmem:[%s3528_s23 + $0xe1] sm:$0xff] }
  0xe9   : > { %3326 = vmatprep.subr.msk.bf16.mxu0 %vm3532_vm1, %v3609_v35  ;;  %v3351_v35 = vpack.c.bf16 %v2544_v34, %v2543_v29 }
  0xef   : > { %3137 = vmatpush3.bf16.xpose.msk.msra.mxu1 %vm3532_vm1, %v3838_v15 }
  0xf0   : > { %3329 = vmatpush3.bf16.xpose.msk.msra.mxu0 %vm3532_vm1, %v3627_v40  ;;  %3140 = vmatprep.subr.msk.bf16.mxu1 %vm3532_vm1, %v3842_v16  ;;  %v2625_v40 = vld [vmem:[%s3528_s23 + $0x19a] sm:$0xff] }
  0xf1   : > { %3332 = vmatprep.subr.msk.bf16.mxu0 %vm3532_vm1, %v3629_v41  ;;  %v2626_v41 = vld [vmem:[%s3528_s23 + $0x1a2] sm:$0xff] }
  0xf7   : > { %3143 = vmatpush3.bf16.xpose.msk.msra.mxu1 %vm3532_vm1, %v3866_v37 }
  0xf8   : > { %3335 = vmatpush3.bf16.xpose.msk.msra.mxu0 %vm3532_vm1, %v3647_v46  ;;  %3146 = vmatprep.subr.msk.bf16.mxu1 %vm3532_vm1, %v3870_v45  ;;  %v3396_v46 = vpack.c.bf16 %v2626_v41, %v2625_v40 }
  0xf9   : > { %3338 = vmatprep.subr.msk.bf16.mxu0 %vm3532_vm1, %v3649_v47 }
  0xff   : > { %3149 = vmatpush3.bf16.xpose.msk.msra.mxu1 %vm3532_vm1, %v3894_v4 }
 0x100   : > { %3341 = vmatpush3.bf16.xpose.msk.msra.mxu0 %vm3532_vm1, %v3667_v52  ;;  %3152 = vmatprep.subr.msk.bf16.mxu1 %vm3532_vm1, %v3898_v7 }
 0x101   : > { %3344 = vmatprep.subr.msk.bf16.mxu0 %vm3532_vm1, %v3669_v53 }
 0x107   : > { %3155 = vmatpush3.bf16.xpose.msk.msra.mxu1 %vm3532_vm1, %v3918_v27 }
 0x108   : > { %3347 = vmatpush3.bf16.xpose.msk.msra.mxu0 %vm3532_vm1, %v3539_v6  ;;  %3158 = vmatprep.subr.msk.bf16.mxu1 %vm3532_vm1, %v3294_v13  ;;  %v2627_v6 = vld [vmem:[%s4219_s1 + $0x40] sm:$0xff] }
 0x109   : > { %3350 = vmatprep.subr.msk.bf16.mxu0 %vm3532_vm1, %v3348_v28 }
 0x10f   : > { %3161 = vmatpush3.bf16.xpose.msk.msra.mxu1 %vm3532_vm1, %v3687_v58 }
 0x110   : > { %3353 = vmatpush3.bf16.xpose.msk.msra.mxu0 %vm3532_vm1, %v3351_v35 }
 0x111   : > { %3356 = vmatprep.subr.msk.bf16.mxu0 %vm3532_vm1, %v3715_v11 }
 0x116   : > { %2799 = vmatmul.mubr.msk.f32.vlgmr.msra.gmra.mrb[0].mxu1 %vm264_vm0, %v2297_v55 }
 0x117   : > { %2935 = vmatmul.mubr.msk.f32.vlgmr.msra.gmra.mrb[0].mxu0 %vm264_vm0, %v2561_v10 }
 0x118   : > { %3359 = vmatpush3.bf16.xpose.msk.msra.mxu0 %vm3532_vm1, %v3756_v24  ;;  %2968 = vmatprep.mubr.msk.f32.mxu0 %vm264_vm0, %v2627_v6 }
 0x119   : > { %3362 = vmatprep.subr.msk.bf16.mxu0 %vm3532_vm1, %v3760_v26 }
 0x120   : > { %3365 = vmatpush3.bf16.xpose.msk.msra.mxu0 %vm3532_vm1, %v3784_v42 }
 0x121   : > { %3368 = vmatprep.subr.msk.bf16.mxu0 %vm3532_vm1, %v3788_v44 }
 0x128   : > { %3371 = vmatpush3.bf16.xpose.msk.msra.mxu0 %vm3532_vm1, %v3812_v60 }
 0x129   : > { %3374 = vmatprep.subr.msk.bf16.mxu0 %vm3532_vm1, %v3816_v62 }
 0x130   : > { %3377 = vmatpush3.bf16.xpose.msk.msra.mxu0 %vm3532_vm1, %v3840_v1 }
 0x131   : > { %3380 = vmatprep.subr.msk.bf16.mxu0 %vm3532_vm1, %v3844_v18 }
 0x138   : > { %3383 = vmatpush3.bf16.xpose.msk.msra.mxu0 %vm3532_vm1, %v3868_v38 }
 0x139   : > { %3386 = vmatprep.subr.msk.bf16.mxu0 %vm3532_vm1, %v3872_v48 }
 0x140   : > { %3389 = vmatpush3.bf16.xpose.msk.msra.mxu0 %vm3532_vm1, %v3896_v5 }
 0x141   : > { %3392 = vmatprep.subr.msk.bf16.mxu0 %vm3532_vm1, %v3900_v8 }
 0x148   : > { %3395 = vmatpush3.bf16.xpose.msk.msra.mxu0 %vm3532_vm1, %v3920_v30 }
 0x149   : > { %3398 = vmatprep.subr.msk.bf16.mxu0 %vm3532_vm1, %v3396_v46 }
 0x150   : > { %3401 = vmatpush3.bf16.xpose.msk.msra.mxu0 %vm3532_vm1, %v3689_v59 }
 0x157   : > { %2969 = vmatmul.mubr.msk.f32.vlgmr.msra.gmra.mrb[0].mxu0 %vm264_vm0, %v2627_v6 }
 0x15a   : > { %v2057_v58 = vpop.permute.xlu0 %2056 }
 0x1e9   : > { %v1013_v47 = vpop.f32.mrb[0].mxu1 }
 0x1ea   : > { %v1015_v52 = vpop.f32.mrb[1].mxu1 }
 0x22a   : > { %v2046_v53 = vpop.f32.mrb[0].mxu0 }
 0x22b   : > { %v3402_v11 = vadd.f32 %v2046_v53, %v1013_v47  ;;  %v2048_v24 = vpop.f32.mrb[1].mxu0 }
 0x22c   : > { %v3403_v25 = vadd.f32 %v2048_v24, %v1015_v52 }
 0x22d   : > { %v2059_v26 = vadd.f32 %v3402_v11, %v2057_v58 }
 0x22e   : > { %v2060_v39 = vadd.f32 %v3403_v25, %v2057_v58 }
 0x22f   : > { %v2061_v42 = vmax.f32 %v2059_v26, 0.0 }
 0x230   : > { %v2062_v43 = vmax.f32 %v2060_v39, 0.0 }
 0x231   : > { %2063 = vst [vmem:[%s192_s20] sm:$0xff] %v2061_v42 }
 0x232   : > { %2064 = vst [vmem:[%s192_s20 + $0x8] sm:$0xff] %v2062_v43 }
 0x233 PF: > { %s13_s14 = sadd.s32 1, %s3467_s14   ;;  %s4224_s12 = smov %s3463_s13 }
 0x234   : > { %p10_p5 = scmp.ge.s32.totalorder %s13_s14, 4   ;;  %s4225_s13 = smov %s4227_s15 }
 0x236   :  { %12 = sbr.rel (!%p10_p5) target bundleno = 2 (0x2), region = 73 }

</bundles_post_ra>
